<compile_context>
chip_gen: v5e
topology: v5e:2x2
jax: 0.10.0
libtpu: 0.0.40
codegen_flags: <defaults>
</compile_context>

<pallas_src>
import functools

import jax
import jax.numpy as jnp
import numpy as np
from jax.experimental import pallas as pl
from jax.experimental.pallas import tpu as pltpu


def _leaky(x):
    # LeakyReLU(negative_slope=0.2)
    return jnp.where(x >= 0, x, 0.2 * x)


def _mgc_kernel(F, N, mm_dtype,
                za_ref, zb_ref, zc_ref, pwb_ref, adjT_ref,
                hs_ref, ha_ref, hb_ref, hc_ref):
    """Per-batch-element body.

    za/zb/zc_ref : (1, F, N)       activations
    pwb_ref      : (2N+5F, F+1)    packed [Wtv;Wav;Wat;Wsw;Waw;Wbw;Wcw | bias col]
    adjT_ref     : (4, N, N)       stacked transposed adjacencies (share, a, b, c)
    hs/ha/hb/hc_ref : (1, F, N)    outputs
    """
    f32 = jnp.float32

    def mm(a, b, trans_b=False):
        # MXU matmul with mm_dtype operands, f32 accumulation.
        a = a.astype(mm_dtype)
        b = b.astype(mm_dtype)
        if trans_b:
            # a @ b^T without materializing the transpose.
            return jax.lax.dot_general(a, b, (((1,), (1,)), ((), ())),
                                       preferred_element_type=f32)
        return jnp.dot(a, b, preferred_element_type=f32)

    def wb(lo, hi):
        # Weight rows [lo, hi) and their folded bias column.
        blk = pwb_ref[lo:hi, :]
        return blk[:, 0:F], blk[:, F:F + 1].astype(f32)

    za = za_ref[0]                                    # (F, N)
    zb = zb_ref[0]
    zc = zc_ref[0]

    o_at = 2 * N                                      # Wat row offset in the slab
    o_w = 2 * N + F                                   # first stage-2 weight offset

    w_tv, b_tv = wb(0, N)                             # (N, F), (N, 1)
    w_av, b_av = wb(N, 2 * N)                         # (N, F), (N, 1)
    w_at, b_at = wb(o_at, o_at + F)                   # (F, F), (F, 1)

    # --- cross-modal bilinear term, kept in (F, N) layout throughout ---
    left = mm(w_tv, za) + b_tv                        # (N, N)
    mid = mm(w_av, zc) + b_av                         # (N, N)
    r0 = mm(w_at, zb) + b_at                          # (F, N)
    # zs = (left @ mid @ r0.T).T = r0 @ mid^T @ left^T
    if N > F:
        # 2*F*N^2 FLOPs, no (N,N) temporary.
        zs = mm(mm(r0, mid, trans_b=True), left, trans_b=True)    # (F, N)
    else:
        # N^3 + F*N^2 FLOPs (cheaper when N <= F).
        zs = mm(r0, mm(left, mid), trans_b=True)                  # (F, N)

    # --- four GCN branches, statically unrolled; direct per-branch stores ---
    xs = (zs, za, zb, zc)
    outs = (hs_ref, ha_ref, hb_ref, hc_ref)
    for k in range(4):
        w_k, b_k = wb(o_w + k * F, o_w + (k + 1) * F)             # (F, F), (F, 1)
        u = _leaky(mm(xs[k], adjT_ref[k]))                        # (F, N)
        g = _leaky(mm(w_k, u) + b_k)                              # (F, N)
        if k == 0:
            outs[k][0] = g.astype(outs[k].dtype)                  # hs: no residual
        else:
            outs[k][0] = (xs[k].astype(jnp.float32) + g).astype(outs[k].dtype)


def pack_params(params, param_dtype=jnp.float32):
    """Pack the module's 18 parameter arrays into two slabs.

    Do this ONCE outside the per-forward path (review: avoid per-call repacking).
    Returns (pwb, adjT):
      pwb  : (2N+5F, F+1)  [Wtv;Wav;Wat;Wsw;Waw;Wbw;Wcw] with bias as last column
      adjT : (4, N, N)     stacked transposed adjacency weights (share, a, b, c)
    """
    (wtv, btv, wav, bav, wat, bat,
     w_sadj, w_sw, b_sw,
     w_aadj, w_aw, b_aw,
     w_badj, w_bw, b_bw,
     w_cadj, w_cw, b_cw) = params

    pw = jnp.concatenate([wtv, wav, wat, w_sw, w_aw, w_bw, w_cw], axis=0)
    pb = jnp.concatenate([btv, bav, bat, b_sw, b_aw, b_bw, b_cw], axis=0)
    pwb = jnp.concatenate([pw, pb], axis=1).astype(param_dtype)       # (2N+5F, F+1)
    adjT = jnp.stack([w_sadj.T, w_aadj.T, w_badj.T, w_cadj.T]
                     ).astype(param_dtype)                            # (4, N, N)
    return pwb, adjT


def _pad_tile_bytes(r, c, itemsize):
    return (-(-r // 8) * 8) * (-(-c // 128) * 128) * itemsize


def _vmem_bytes_estimate(F, N, act_itemsize, par_itemsize):
    acts = 3 * 2 * _pad_tile_bytes(F, N, act_itemsize)      # inputs (double-buffered)
    outs = 4 * 2 * _pad_tile_bytes(F, N, 4)                 # outputs (double-buffered)
    pars = 2 * (_pad_tile_bytes(2 * N + 5 * F, F + 1, par_itemsize)
                + 4 * _pad_tile_bytes(N, N, par_itemsize))
    tmps = 3 * _pad_tile_bytes(N, N, 4) + 8 * _pad_tile_bytes(F, N, 4)
    return acts + outs + pars + tmps


def modal_graph_convolution(za, zb, zc, packed_params,
                            matmul_dtype=jnp.float32):
    """packed_params = pack_params(<18-array list as in the PyTorch module>)."""
    B, F, N = za.shape
    assert zb.shape == (B, F, N) and zc.shape == (B, F, N)
    pwb, adjT = packed_params
    assert pwb.shape == (2 * N + 5 * F, F + 1)
    assert adjT.shape == (4, N, N)

    act_spec = pl.BlockSpec((1, F, N), lambda b: (b, 0, 0))
    # Constant index maps -> parameter blocks are not re-fetched across grid steps.
    pwb_spec = pl.BlockSpec(pwb.shape, lambda b: (0, 0))
    adj_spec = pl.BlockSpec(adjT.shape, lambda b: (0, 0, 0))
    out_spec = pl.BlockSpec((1, F, N), lambda b: (b, 0, 0))

    est = _vmem_bytes_estimate(F, N, za.dtype.itemsize, pwb.dtype.itemsize)
    vmem_limit = None
    if est > 12 * 2**20:
        vmem_limit = min(100 * 2**20, int(1.5 * est))

    out_sd = jax.ShapeDtypeStruct((B, F, N), jnp.float32)
    hs, ha, hb, hc = pl.pallas_call(
        functools.partial(_mgc_kernel, F, N, matmul_dtype),
        grid=(B,),
        in_specs=[act_spec, act_spec, act_spec, pwb_spec, adj_spec],
        out_specs=[out_spec, out_spec, out_spec, out_spec],
        out_shape=(out_sd, out_sd, out_sd, out_sd),
        compiler_params=pltpu.CompilerParams(
            dimension_semantics=("parallel",),
            vmem_limit_bytes=vmem_limit),
    )(za, zb, zc, pwb, adjT)
    return hs, ha, hb, hc


# ---------------------------------------------------------------------------
# Plain-JAX reference (mirrors the PyTorch forward) for correctness checking.
# ---------------------------------------------------------------------------
def _ref_forward(za, zb, zc, p):
    (wtv, btv, wav, bav, wat, bat,
     w_sadj, w_sw, b_sw,
     w_aadj, w_aw, b_aw,
     w_badj, w_bw, b_bw,
     w_cadj, w_cw, b_cw) = p

    def c1(w, x, b=None):
        y = jnp.einsum("oi,bil->bol", w, x)
        if b is not None:
            y = y + b[None, :, :]
        return y

    left = c1(wtv, za, btv)                       # (B, N, N)
    mid = c1(wav, zc, bav)                        # (B, N, N)
    right = jnp.swapaxes(c1(wat, zb, bat), 1, 2)  # (B, N, F)
    zs = jnp.swapaxes(left @ mid @ right, 1, 2)   # (B, F, N)

    def gcn(x, w_adj, w_w, b_w):
        t = _leaky(c1(w_adj, jnp.swapaxes(x, 1, 2)))          # (B, N, F)
        return _leaky(c1(w_w, jnp.swapaxes(t, 1, 2), b_w))    # (B, F, N)

    hs = gcn(zs, w_sadj, w_sw, b_sw)
    ha = za + gcn(za, w_aadj, w_aw, b_aw)
    hb = zb + gcn(zb, w_badj, w_bw, b_bw)
    hc = zc + gcn(zc, w_cadj, w_cw, b_cw)
    return hs, ha, hb, hc


if __name__ == "__main__":
    # Module constraints implied by forward():
    #   seq_len == num_nodes (adjacency convs act on the node axis),
    #   out_features == in_features (residual ha = za + GCN_A(za)).
    key = jax.random.PRNGKey(0)

    def make_case(case_key, B, F, N):
        ks = list(jax.random.split(case_key, 24))

        def nrm(k, shape, scale=0.1):
            return (scale * jax.random.normal(k, shape)).astype(jnp.float32)

        za = nrm(ks[0], (B, F, N), 1.0)
        zb = nrm(ks[1], (B, F, N), 1.0)
        zc = nrm(ks[2], (B, F, N), 1.0)
        # Conv1d kernels with k=1 squeezed; biases kept as (rows, 1) columns.
        params = [
            nrm(ks[3], (N, F)), nrm(ks[4], (N, 1)),    # Wtv  weight / bias
            nrm(ks[5], (N, F)), nrm(ks[6], (N, 1)),    # Wav  weight / bias
            nrm(ks[7], (F, F)), nrm(ks[8], (F, 1)),    # Wat  weight / bias
            nrm(ks[9], (N, N)),                        # share_adj (no bias)
            nrm(ks[10], (F, F)), nrm(ks[11], (F, 1)),  # share_weight
            nrm(ks[12], (N, N)),                       # m_a_adj
            nrm(ks[13], (F, F)), nrm(ks[14], (F, 1)),  # m_a_weight
            nrm(ks[15], (N, N)),                       # m_b_adj
            nrm(ks[16], (F, F)), nrm(ks[17], (F, 1)),  # m_b_weight
            nrm(ks[18], (N, N)),                       # m_c_adj
            nrm(ks[19], (F, F)), nrm(ks[20], (F, 1)),  # m_c_weight
        ]
        return (za, zb, zc), params

    def check(case_name, case_key, B, F, N, matmul_dtype, rtol, atol):
        (za, zb, zc), params = make_case(case_key, B, F, N)
        packed = pack_params(params, param_dtype=matmul_dtype)   # packed once
        outs = modal_graph_convolution(za, zb, zc, packed,
                                       matmul_dtype=matmul_dtype)
        outs = jax.block_until_ready(outs)
        refs = _ref_forward(za, zb, zc, params)
        for o, r, nm in zip(outs, refs, ("hs", "ha", "hb", "hc")):
            np.testing.assert_allclose(np.asarray(o), np.asarray(r),
                                       rtol=rtol, atol=atol,
                                       err_msg=f"{case_name}:{nm}")

    k1, k2 = jax.random.split(key)
    # N <= F (left@mid association), full f32.
    check("f32_NleF", k1, B=2, F=32, N=16,
          matmul_dtype=jnp.float32, rtol=1e-3, atol=1e-3)
    # N > F (re-associated trans-B bilinear path), full f32.
    check("f32_NgtF", k2, B=2, F=16, N=32,
          matmul_dtype=jnp.float32, rtol=1e-3, atol=1e-3)
    # bf16 MXU operands with f32 accumulation (v5e/v6e fast path); loose tolerance
    # only sanity-checks the reduced-precision path.
    check("bf16", k1, B=2, F=32, N=16,
          matmul_dtype=jnp.bfloat16, rtol=1e-1, atol=1e-1)

    print("KERNEL_OK")
</pallas_src>

<mosaic_0001>
module attributes {stable_mosaic.version = 11 : i64} {
  func.func @_mgc_kernel(%arg0: i32, %arg1: memref<1x32x16xf32, #tpu.memory_space<vmem>>, %arg2: memref<1x32x16xf32, #tpu.memory_space<vmem>>, %arg3: memref<1x32x16xf32, #tpu.memory_space<vmem>>, %arg4: memref<192x33xf32, #tpu.memory_space<vmem>>, %arg5: memref<4x16x16xf32, #tpu.memory_space<vmem>>, %arg6: memref<1x32x16xf32, #tpu.memory_space<vmem>>, %arg7: memref<1x32x16xf32, #tpu.memory_space<vmem>>, %arg8: memref<1x32x16xf32, #tpu.memory_space<vmem>>, %arg9: memref<1x32x16xf32, #tpu.memory_space<vmem>>) attributes {dimension_semantics = [#tpu.dimension_semantics<parallel>], iteration_bounds = array<i64: 2>, scalar_prefetch = 0 : i64, scratch_operands = 0 : i64, tpu.core_type = #tpu.core_type<tc>, window_params = [{transform_indices = @transform_0, window_bounds = array<i64: 1, 32, 16>}, {transform_indices = @transform_1, window_bounds = array<i64: 1, 32, 16>}, {transform_indices = @transform_2, window_bounds = array<i64: 1, 32, 16>}, {pipeline_mode = #tpu.pipeline_mode<synchronous>, transform_indices = @transform_3, window_bounds = array<i64: 192, 33>}, {pipeline_mode = #tpu.pipeline_mode<synchronous>, transform_indices = @transform_4, window_bounds = array<i64: 4, 16, 16>}, {transform_indices = @transform_5, window_bounds = array<i64: 1, 32, 16>}, {transform_indices = @transform_6, window_bounds = array<i64: 1, 32, 16>}, {transform_indices = @transform_7, window_bounds = array<i64: 1, 32, 16>}, {transform_indices = @transform_8, window_bounds = array<i64: 1, 32, 16>}]} {
    %c0 = arith.constant 0 : index
    %c0_0 = arith.constant 0 : index
    %c0_1 = arith.constant 0 : index
    %0 = vector.load %arg1[%c0, %c0_0, %c0_1] : memref<1x32x16xf32, #tpu.memory_space<vmem>>, vector<1x32x16xf32>
    %1 = vector.shape_cast %0 : vector<1x32x16xf32> to vector<32x16xf32>
    %c0_2 = arith.constant 0 : index
    %c0_3 = arith.constant 0 : index
    %c0_4 = arith.constant 0 : index
    %2 = vector.load %arg2[%c0_2, %c0_3, %c0_4] : memref<1x32x16xf32, #tpu.memory_space<vmem>>, vector<1x32x16xf32>
    %3 = vector.shape_cast %2 : vector<1x32x16xf32> to vector<32x16xf32>
    %c0_5 = arith.constant 0 : index
    %c0_6 = arith.constant 0 : index
    %c0_7 = arith.constant 0 : index
    %4 = vector.load %arg3[%c0_5, %c0_6, %c0_7] : memref<1x32x16xf32, #tpu.memory_space<vmem>>, vector<1x32x16xf32>
    %5 = vector.shape_cast %4 : vector<1x32x16xf32> to vector<32x16xf32>
    %c0_8 = arith.constant 0 : index
    %c0_9 = arith.constant 0 : index
    %6 = vector.load %arg4[%c0_8, %c0_9] : memref<192x33xf32, #tpu.memory_space<vmem>>, vector<16x33xf32>
    %7 = vector.extract_strided_slice %6 {offsets = [0, 0], sizes = [16, 32], strides = [1, 1]} : vector<16x33xf32> to vector<16x32xf32>
    %8 = vector.extract_strided_slice %6 {offsets = [0, 32], sizes = [16, 1], strides = [1, 1]} : vector<16x33xf32> to vector<16x1xf32>
    %c16 = arith.constant 16 : index
    %c0_10 = arith.constant 0 : index
    %9 = vector.load %arg4[%c16, %c0_10] : memref<192x33xf32, #tpu.memory_space<vmem>>, vector<16x33xf32>
    %10 = vector.extract_strided_slice %9 {offsets = [0, 0], sizes = [16, 32], strides = [1, 1]} : vector<16x33xf32> to vector<16x32xf32>
    %11 = vector.extract_strided_slice %9 {offsets = [0, 32], sizes = [16, 1], strides = [1, 1]} : vector<16x33xf32> to vector<16x1xf32>
    %c32 = arith.constant 32 : index
    %c0_11 = arith.constant 0 : index
    %12 = vector.load %arg4[%c32, %c0_11] : memref<192x33xf32, #tpu.memory_space<vmem>>, vector<32x33xf32>
    %13 = vector.extract_strided_slice %12 {offsets = [0, 0], sizes = [32, 32], strides = [1, 1]} : vector<32x33xf32> to vector<32x32xf32>
    %14 = vector.extract_strided_slice %12 {offsets = [0, 32], sizes = [32, 1], strides = [1, 1]} : vector<32x33xf32> to vector<32x1xf32>
    %cst = arith.constant dense<0.000000e+00> : vector<16x16xf32>
    %15 = tpu.matmul %7, %1, %cst {dimension_numbers = #tpu.dot_dimension_numbers<[1], [0], [0], [1], [0, 0, 1, 1], [], []>} : vector<16x32xf32>, vector<32x16xf32>, vector<16x16xf32> -> vector<16x16xf32>
    %16 = vector.broadcast %8 : vector<16x1xf32> to vector<16x16xf32>
    %17 = arith.addf %15, %16 : vector<16x16xf32>
    %cst_12 = arith.constant dense<0.000000e+00> : vector<16x16xf32>
    %18 = tpu.matmul %10, %5, %cst_12 {dimension_numbers = #tpu.dot_dimension_numbers<[1], [0], [0], [1], [0, 0, 1, 1], [], []>} : vector<16x32xf32>, vector<32x16xf32>, vector<16x16xf32> -> vector<16x16xf32>
    %19 = vector.broadcast %11 : vector<16x1xf32> to vector<16x16xf32>
    %20 = arith.addf %18, %19 : vector<16x16xf32>
    %cst_13 = arith.constant dense<0.000000e+00> : vector<32x16xf32>
    %21 = tpu.matmul %13, %3, %cst_13 {dimension_numbers = #tpu.dot_dimension_numbers<[1], [0], [0], [1], [0, 0, 1, 1], [], []>} : vector<32x32xf32>, vector<32x16xf32>, vector<32x16xf32> -> vector<32x16xf32>
    %22 = vector.broadcast %14 : vector<32x1xf32> to vector<32x16xf32>
    %23 = arith.addf %21, %22 : vector<32x16xf32>
    %cst_14 = arith.constant dense<0.000000e+00> : vector<16x16xf32>
    %24 = tpu.matmul %17, %20, %cst_14 {dimension_numbers = #tpu.dot_dimension_numbers<[1], [0], [0], [1], [0, 0, 1, 1], [], []>} : vector<16x16xf32>, vector<16x16xf32>, vector<16x16xf32> -> vector<16x16xf32>
    %cst_15 = arith.constant dense<0.000000e+00> : vector<32x16xf32>
    %25 = tpu.matmul %23, %24, %cst_15 {dimension_numbers = #tpu.dot_dimension_numbers<[1], [1], [0], [0], [0, 0, 1, 0], [], []>} : vector<32x16xf32>, vector<16x16xf32>, vector<32x16xf32> -> vector<32x16xf32>
    %c64 = arith.constant 64 : index
    %c0_16 = arith.constant 0 : index
    %26 = vector.load %arg4[%c64, %c0_16] : memref<192x33xf32, #tpu.memory_space<vmem>>, vector<32x33xf32>
    %27 = vector.extract_strided_slice %26 {offsets = [0, 0], sizes = [32, 32], strides = [1, 1]} : vector<32x33xf32> to vector<32x32xf32>
    %28 = vector.extract_strided_slice %26 {offsets = [0, 32], sizes = [32, 1], strides = [1, 1]} : vector<32x33xf32> to vector<32x1xf32>
    %c0_17 = arith.constant 0 : index
    %c0_18 = arith.constant 0 : index
    %c0_19 = arith.constant 0 : index
    %29 = vector.load %arg5[%c0_17, %c0_18, %c0_19] : memref<4x16x16xf32, #tpu.memory_space<vmem>>, vector<1x16x16xf32>
    %30 = vector.shape_cast %29 : vector<1x16x16xf32> to vector<16x16xf32>
    %cst_20 = arith.constant dense<0.000000e+00> : vector<32x16xf32>
    %31 = tpu.matmul %25, %30, %cst_20 {dimension_numbers = #tpu.dot_dimension_numbers<[1], [0], [0], [1], [0, 0, 1, 1], [], []>} : vector<32x16xf32>, vector<16x16xf32>, vector<32x16xf32> -> vector<32x16xf32>
    %cst_21 = arith.constant 0.000000e+00 : f32
    %32 = vector.broadcast %cst_21 : f32 to vector<32x16xf32>
    %33 = arith.cmpf oge, %31, %32 : vector<32x16xf32>
    %cst_22 = arith.constant 2.000000e-01 : f32
    %34 = vector.broadcast %cst_22 : f32 to vector<32x16xf32>
    %35 = arith.mulf %34, %31 : vector<32x16xf32>
    %36 = arith.select %33, %31, %35 : vector<32x16xi1>, vector<32x16xf32>
    %cst_23 = arith.constant dense<0.000000e+00> : vector<32x16xf32>
    %37 = tpu.matmul %27, %36, %cst_23 {dimension_numbers = #tpu.dot_dimension_numbers<[1], [0], [0], [1], [0, 0, 1, 1], [], []>} : vector<32x32xf32>, vector<32x16xf32>, vector<32x16xf32> -> vector<32x16xf32>
    %38 = vector.broadcast %28 : vector<32x1xf32> to vector<32x16xf32>
    %39 = arith.addf %37, %38 : vector<32x16xf32>
    %cst_24 = arith.constant 0.000000e+00 : f32
    %40 = vector.broadcast %cst_24 : f32 to vector<32x16xf32>
    %41 = arith.cmpf oge, %39, %40 : vector<32x16xf32>
    %cst_25 = arith.constant 2.000000e-01 : f32
    %42 = vector.broadcast %cst_25 : f32 to vector<32x16xf32>
    %43 = arith.mulf %42, %39 : vector<32x16xf32>
    %44 = arith.select %41, %39, %43 : vector<32x16xi1>, vector<32x16xf32>
    %c0_26 = arith.constant 0 : index
    %c0_27 = arith.constant 0 : index
    %c0_28 = arith.constant 0 : index
    %45 = vector.load %arg6[%c0_26, %c0_27, %c0_28] : memref<1x32x16xf32, #tpu.memory_space<vmem>>, vector<1x32x16xf32>
    %46 = vector.shape_cast %45 : vector<1x32x16xf32> to vector<32x16xf32>
    %47 = vector.shape_cast %44 : vector<32x16xf32> to vector<1x32x16xf32>
    tpu.vector_store %arg6[%c0_26, %c0_27, %c0_28], %47 {strides = array<i32>} : memref<1x32x16xf32, #tpu.memory_space<vmem>>, vector<1x32x16xf32>,
    %c96 = arith.constant 96 : index
    %c0_29 = arith.constant 0 : index
    %48 = vector.load %arg4[%c96, %c0_29] : memref<192x33xf32, #tpu.memory_space<vmem>>, vector<32x33xf32>
    %49 = vector.extract_strided_slice %48 {offsets = [0, 0], sizes = [32, 32], strides = [1, 1]} : vector<32x33xf32> to vector<32x32xf32>
    %50 = vector.extract_strided_slice %48 {offsets = [0, 32], sizes = [32, 1], strides = [1, 1]} : vector<32x33xf32> to vector<32x1xf32>
    %c1 = arith.constant 1 : index
    %c0_30 = arith.constant 0 : index
    %c0_31 = arith.constant 0 : index
    %51 = vector.load %arg5[%c1, %c0_30, %c0_31] : memref<4x16x16xf32, #tpu.memory_space<vmem>>, vector<1x16x16xf32>
    %52 = vector.shape_cast %51 : vector<1x16x16xf32> to vector<16x16xf32>
    %cst_32 = arith.constant dense<0.000000e+00> : vector<32x16xf32>
    %53 = tpu.matmul %1, %52, %cst_32 {dimension_numbers = #tpu.dot_dimension_numbers<[1], [0], [0], [1], [0, 0, 1, 1], [], []>} : vector<32x16xf32>, vector<16x16xf32>, vector<32x16xf32> -> vector<32x16xf32>
    %cst_33 = arith.constant 0.000000e+00 : f32
    %54 = vector.broadcast %cst_33 : f32 to vector<32x16xf32>
    %55 = arith.cmpf oge, %53, %54 : vector<32x16xf32>
    %cst_34 = arith.constant 2.000000e-01 : f32
    %56 = vector.broadcast %cst_34 : f32 to vector<32x16xf32>
    %57 = arith.mulf %56, %53 : vector<32x16xf32>
    %58 = arith.select %55, %53, %57 : vector<32x16xi1>, vector<32x16xf32>
    %cst_35 = arith.constant dense<0.000000e+00> : vector<32x16xf32>
    %59 = tpu.matmul %49, %58, %cst_35 {dimension_numbers = #tpu.dot_dimension_numbers<[1], [0], [0], [1], [0, 0, 1, 1], [], []>} : vector<32x32xf32>, vector<32x16xf32>, vector<32x16xf32> -> vector<32x16xf32>
    %60 = vector.broadcast %50 : vector<32x1xf32> to vector<32x16xf32>
    %61 = arith.addf %59, %60 : vector<32x16xf32>
    %cst_36 = arith.constant 0.000000e+00 : f32
    %62 = vector.broadcast %cst_36 : f32 to vector<32x16xf32>
    %63 = arith.cmpf oge, %61, %62 : vector<32x16xf32>
    %cst_37 = arith.constant 2.000000e-01 : f32
    %64 = vector.broadcast %cst_37 : f32 to vector<32x16xf32>
    %65 = arith.mulf %64, %61 : vector<32x16xf32>
    %66 = arith.select %63, %61, %65 : vector<32x16xi1>, vector<32x16xf32>
    %67 = arith.addf %1, %66 : vector<32x16xf32>
    %c0_38 = arith.constant 0 : index
    %c0_39 = arith.constant 0 : index
    %c0_40 = arith.constant 0 : index
    %68 = vector.load %arg7[%c0_38, %c0_39, %c0_40] : memref<1x32x16xf32, #tpu.memory_space<vmem>>, vector<1x32x16xf32>
    %69 = vector.shape_cast %68 : vector<1x32x16xf32> to vector<32x16xf32>
    %70 = vector.shape_cast %67 : vector<32x16xf32> to vector<1x32x16xf32>
    tpu.vector_store %arg7[%c0_38, %c0_39, %c0_40], %70 {strides = array<i32>} : memref<1x32x16xf32, #tpu.memory_space<vmem>>, vector<1x32x16xf32>,
    %c128 = arith.constant 128 : index
    %c0_41 = arith.constant 0 : index
    %71 = vector.load %arg4[%c128, %c0_41] : memref<192x33xf32, #tpu.memory_space<vmem>>, vector<32x33xf32>
    %72 = vector.extract_strided_slice %71 {offsets = [0, 0], sizes = [32, 32], strides = [1, 1]} : vector<32x33xf32> to vector<32x32xf32>
    %73 = vector.extract_strided_slice %71 {offsets = [0, 32], sizes = [32, 1], strides = [1, 1]} : vector<32x33xf32> to vector<32x1xf32>
    %c2 = arith.constant 2 : index
    %c0_42 = arith.constant 0 : index
    %c0_43 = arith.constant 0 : index
    %74 = vector.load %arg5[%c2, %c0_42, %c0_43] : memref<4x16x16xf32, #tpu.memory_space<vmem>>, vector<1x16x16xf32>
    %75 = vector.shape_cast %74 : vector<1x16x16xf32> to vector<16x16xf32>
    %cst_44 = arith.constant dense<0.000000e+00> : vector<32x16xf32>
    %76 = tpu.matmul %3, %75, %cst_44 {dimension_numbers = #tpu.dot_dimension_numbers<[1], [0], [0], [1], [0, 0, 1, 1], [], []>} : vector<32x16xf32>, vector<16x16xf32>, vector<32x16xf32> -> vector<32x16xf32>
    %cst_45 = arith.constant 0.000000e+00 : f32
    %77 = vector.broadcast %cst_45 : f32 to vector<32x16xf32>
    %78 = arith.cmpf oge, %76, %77 : vector<32x16xf32>
    %cst_46 = arith.constant 2.000000e-01 : f32
    %79 = vector.broadcast %cst_46 : f32 to vector<32x16xf32>
    %80 = arith.mulf %79, %76 : vector<32x16xf32>
    %81 = arith.select %78, %76, %80 : vector<32x16xi1>, vector<32x16xf32>
    %cst_47 = arith.constant dense<0.000000e+00> : vector<32x16xf32>
    %82 = tpu.matmul %72, %81, %cst_47 {dimension_numbers = #tpu.dot_dimension_numbers<[1], [0], [0], [1], [0, 0, 1, 1], [], []>} : vector<32x32xf32>, vector<32x16xf32>, vector<32x16xf32> -> vector<32x16xf32>
    %83 = vector.broadcast %73 : vector<32x1xf32> to vector<32x16xf32>
    %84 = arith.addf %82, %83 : vector<32x16xf32>
    %cst_48 = arith.constant 0.000000e+00 : f32
    %85 = vector.broadcast %cst_48 : f32 to vector<32x16xf32>
    %86 = arith.cmpf oge, %84, %85 : vector<32x16xf32>
    %cst_49 = arith.constant 2.000000e-01 : f32
    %87 = vector.broadcast %cst_49 : f32 to vector<32x16xf32>
    %88 = arith.mulf %87, %84 : vector<32x16xf32>
    %89 = arith.select %86, %84, %88 : vector<32x16xi1>, vector<32x16xf32>
    %90 = arith.addf %3, %89 : vector<32x16xf32>
    %c0_50 = arith.constant 0 : index
    %c0_51 = arith.constant 0 : index
    %c0_52 = arith.constant 0 : index
    %91 = vector.load %arg8[%c0_50, %c0_51, %c0_52] : memref<1x32x16xf32, #tpu.memory_space<vmem>>, vector<1x32x16xf32>
    %92 = vector.shape_cast %91 : vector<1x32x16xf32> to vector<32x16xf32>
    %93 = vector.shape_cast %90 : vector<32x16xf32> to vector<1x32x16xf32>
    tpu.vector_store %arg8[%c0_50, %c0_51, %c0_52], %93 {strides = array<i32>} : memref<1x32x16xf32, #tpu.memory_space<vmem>>, vector<1x32x16xf32>,
    %c160 = arith.constant 160 : index
    %c0_53 = arith.constant 0 : index
    %94 = vector.load %arg4[%c160, %c0_53] : memref<192x33xf32, #tpu.memory_space<vmem>>, vector<32x33xf32>
    %95 = vector.extract_strided_slice %94 {offsets = [0, 0], sizes = [32, 32], strides = [1, 1]} : vector<32x33xf32> to vector<32x32xf32>
    %96 = vector.extract_strided_slice %94 {offsets = [0, 32], sizes = [32, 1], strides = [1, 1]} : vector<32x33xf32> to vector<32x1xf32>
    %c3 = arith.constant 3 : index
    %c0_54 = arith.constant 0 : index
    %c0_55 = arith.constant 0 : index
    %97 = vector.load %arg5[%c3, %c0_54, %c0_55] : memref<4x16x16xf32, #tpu.memory_space<vmem>>, vector<1x16x16xf32>
    %98 = vector.shape_cast %97 : vector<1x16x16xf32> to vector<16x16xf32>
    %cst_56 = arith.constant dense<0.000000e+00> : vector<32x16xf32>
    %99 = tpu.matmul %5, %98, %cst_56 {dimension_numbers = #tpu.dot_dimension_numbers<[1], [0], [0], [1], [0, 0, 1, 1], [], []>} : vector<32x16xf32>, vector<16x16xf32>, vector<32x16xf32> -> vector<32x16xf32>
    %cst_57 = arith.constant 0.000000e+00 : f32
    %100 = vector.broadcast %cst_57 : f32 to vector<32x16xf32>
    %101 = arith.cmpf oge, %99, %100 : vector<32x16xf32>
    %cst_58 = arith.constant 2.000000e-01 : f32
    %102 = vector.broadcast %cst_58 : f32 to vector<32x16xf32>
    %103 = arith.mulf %102, %99 : vector<32x16xf32>
    %104 = arith.select %101, %99, %103 : vector<32x16xi1>, vector<32x16xf32>
    %cst_59 = arith.constant dense<0.000000e+00> : vector<32x16xf32>
    %105 = tpu.matmul %95, %104, %cst_59 {dimension_numbers = #tpu.dot_dimension_numbers<[1], [0], [0], [1], [0, 0, 1, 1], [], []>} : vector<32x32xf32>, vector<32x16xf32>, vector<32x16xf32> -> vector<32x16xf32>
    %106 = vector.broadcast %96 : vector<32x1xf32> to vector<32x16xf32>
    %107 = arith.addf %105, %106 : vector<32x16xf32>
    %cst_60 = arith.constant 0.000000e+00 : f32
    %108 = vector.broadcast %cst_60 : f32 to vector<32x16xf32>
    %109 = arith.cmpf oge, %107, %108 : vector<32x16xf32>
    %cst_61 = arith.constant 2.000000e-01 : f32
    %110 = vector.broadcast %cst_61 : f32 to vector<32x16xf32>
    %111 = arith.mulf %110, %107 : vector<32x16xf32>
    %112 = arith.select %109, %107, %111 : vector<32x16xi1>, vector<32x16xf32>
    %113 = arith.addf %5, %112 : vector<32x16xf32>
    %c0_62 = arith.constant 0 : index
    %c0_63 = arith.constant 0 : index
    %c0_64 = arith.constant 0 : index
    %114 = vector.load %arg9[%c0_62, %c0_63, %c0_64] : memref<1x32x16xf32, #tpu.memory_space<vmem>>, vector<1x32x16xf32>
    %115 = vector.shape_cast %114 : vector<1x32x16xf32> to vector<32x16xf32>
    %116 = vector.shape_cast %113 : vector<32x16xf32> to vector<1x32x16xf32>
    tpu.vector_store %arg9[%c0_62, %c0_63, %c0_64], %116 {strides = array<i32>} : memref<1x32x16xf32, #tpu.memory_space<vmem>>, vector<1x32x16xf32>,
    return
  }
  func.func @transform_0(%arg0: i32) -> (i32, i32, i32) {
    %c0_i32 = arith.constant 0 : i32
    %c0_i32_0 = arith.constant 0 : i32
    %c0_i32_1 = arith.constant 0 : i32
    return %arg0, %c0_i32, %c0_i32_0 : i32, i32, i32
  }
  func.func @transform_1(%arg0: i32) -> (i32, i32, i32) {
    %c0_i32 = arith.constant 0 : i32
    %c0_i32_0 = arith.constant 0 : i32
    %c0_i32_1 = arith.constant 0 : i32
    return %arg0, %c0_i32, %c0_i32_0 : i32, i32, i32
  }
  func.func @transform_2(%arg0: i32) -> (i32, i32, i32) {
    %c0_i32 = arith.constant 0 : i32
    %c0_i32_0 = arith.constant 0 : i32
    %c0_i32_1 = arith.constant 0 : i32
    return %arg0, %c0_i32, %c0_i32_0 : i32, i32, i32
  }
  func.func @transform_3(%arg0: i32) -> (i32, i32) {
    %c0_i32 = arith.constant 0 : i32
    %c0_i32_0 = arith.constant 0 : i32
    %c0_i32_1 = arith.constant 0 : i32
    return %c0_i32, %c0_i32_0 : i32, i32
  }
  func.func @transform_4(%arg0: i32) -> (i32, i32, i32) {
    %c0_i32 = arith.constant 0 : i32
    %c0_i32_0 = arith.constant 0 : i32
    %c0_i32_1 = arith.constant 0 : i32
    %c0_i32_2 = arith.constant 0 : i32
    return %c0_i32, %c0_i32_0, %c0_i32_1 : i32, i32, i32
  }
  func.func @transform_5(%arg0: i32) -> (i32, i32, i32) {
    %c0_i32 = arith.constant 0 : i32
    %c0_i32_0 = arith.constant 0 : i32
    %c0_i32_1 = arith.constant 0 : i32
    return %arg0, %c0_i32, %c0_i32_0 : i32, i32, i32
  }
  func.func @transform_6(%arg0: i32) -> (i32, i32, i32) {
    %c0_i32 = arith.constant 0 : i32
    %c0_i32_0 = arith.constant 0 : i32
    %c0_i32_1 = arith.constant 0 : i32
    return %arg0, %c0_i32, %c0_i32_0 : i32, i32, i32
  }
  func.func @transform_7(%arg0: i32) -> (i32, i32, i32) {
    %c0_i32 = arith.constant 0 : i32
    %c0_i32_0 = arith.constant 0 : i32
    %c0_i32_1 = arith.constant 0 : i32
    return %arg0, %c0_i32, %c0_i32_0 : i32, i32, i32
  }
  func.func @transform_8(%arg0: i32) -> (i32, i32, i32) {
    %c0_i32 = arith.constant 0 : i32
    %c0_i32_0 = arith.constant 0 : i32
    %c0_i32_1 = arith.constant 0 : i32
    return %arg0, %c0_i32, %c0_i32_0 : i32, i32, i32
  }
}

</mosaic_0001>

<bundles_post_ra>
// kernel: tpu_custom_call.1
= control target key start
LH: loop header
LB: loop body
LE: loop exit
PB: predicated region body
PF: predicated region fallthrough
CT: control target
= control target key end

     0   :  { %s1485_s27 = smov 0   ;;  %s1848_s0 = inlined_call_operand.vmem [shape: f32[2,32,16], index: 0, kind: input, shape index: {}]   ;;  %s1849_s1 = inlined_call_operand.vmem [shape: f32[2,32,16], index: 1, kind: input, shape index: {}]   ;;  %s1850_s2 = inlined_call_operand.vmem [shape: f32[2,32,16], index: 2, kind: input, shape index: {}]   ;;  %s1851_s3 = inlined_call_operand.vmem [shape: f32[192,33], index: 3, kind: input, shape index: {}]   ;;  %s1852_s4 = inlined_call_operand.vmem [shape: f32[4,16,16], index: 4, kind: input, shape index: {}]   ;;  %s1853_s5 = inlined_call_operand.vmem [shape: f32[2,32,16], index: 5, kind: output, shape index: {0}]   ;;  %s1854_s6 = inlined_call_operand.vmem [shape: f32[2,32,16], index: 6, kind: output, shape index: {1}]   ;;  %s1855_s7 = inlined_call_operand.vmem [shape: f32[2,32,16], index: 7, kind: output, shape index: {2}]   ;;  %s1856_s8 = inlined_call_operand.vmem [shape: f32[2,32,16], index: 8, kind: output, shape index: {3}]  }
   0x1 LB: > { %s1333_s28 = sadd.s32 4294967295, %s1437_s27   ;;  %p1337_p0 = scmp.ge.s32.totalorder %s1437_s27, 1  ;;  %s1437_s27 = sphi %s1485_s27, %s19_s27  }
   0x2   : > { %p289_p1 = scmp.lt.s32.totalorder %s1437_s27, 3 }
   0x4   : > { %p290_p2 = pnand %p1337_p0, %p289_p1 }
   0x5   : > { %p348_p3 = scmp.lt.s32.totalorder (!%p290_p2), %s1333_s28, 1 }
   0x6   : > { %293 = sbr.rel (%p290_p2) target bundleno = 793 (0x319), region = 40 }
   0xb   : > { %v1496_v0 = vld [vmem:[%s1851_s3 + $0x18] sm:$0xff]  ;;  %v395_v1 = vld [vmem:[%s1851_s3] sm:$0xff]  ;;  %v1439_v2 = vmov 32   ;;  %s1858_s28 = smov (!%p348_p3, %s1333_s28), 1  ;;  %v397_v8 = vld [vmem:[%s1851_s3 + $0x10] sm:$0xff]  ;;  %vm413_vm0 = vcmask 261120  }
   0xc   : > { %1429 = vset.pattern.permute.xlu1 %v1439_v2  ;;  %1428 = vset.pattern.permute.xlu0 %v1439_v2  ;;  %v399_v3 = vld [vmem:[%s1851_s3 + $0x20] sm:$0xff]  ;;  %s1505_s13 = sshll.u32 %s1858_s28, 5  ;;  %v396_v9 = vld [vmem:[%s1851_s3 + $0x8] sm:$0xff]  ;;  %v401_v17 = vld [vmem:[%s1851_s3 + $0x30] sm:$0xff]  ;;  %vm535_vm1 = vcmask 130048  }
   0xd   : > { %448 = vperm.xlu0 %1428, %v1496_v0   ;;  %405 = vperm.xlu1 %1429, %v395_v1   ;;  %s352_s16 = scalar_lea.vmem %s1848_s0, %s1505_s13  ;;  %s357_s19 = scalar_lea.vmem %s1849_s1, %s1505_s13  ;;  %v400_v14 = vld [vmem:[%s1851_s3 + $0x28] sm:$0xff]  ;;  %v402_v18 = vld [vmem:[%s1851_s3 + $0x38] sm:$0xff]  ;;  %v1587_v22 = vld [vmem:[%s1851_s3 + $0x50] sm:$0xff] }
   0xe   : > { %1430 = vset.pattern.permute.xlu2 %v1439_v2  ;;  %v1515_v4 = vld [vmem:[%s352_s16 + $0x18] sm:$0xff]  ;;  %v1519_v6 = vld [vmem:[%s352_s16 + $0x10] sm:$0xff]  ;;  %v1531_v10 = vld [vmem:[%s352_s16 + $0x8] sm:$0xff]  ;;  %s362_s26 = scalar_lea.vmem %s1850_s2, %s1505_s13  ;;  %s1761_s23 = scalar_lea.vmem %s1854_s6, %s1505_s13 }
   0xf   : > { %480 = vperm.xlu2 %1430, %v399_v3   ;;  %v1517_v5 = vld [vmem:[%s357_s19 + $0x18] sm:$0xff]  ;;  %1415 = vmatpush.msra.mxu1 %v1515_v4  ;;  %v1523_v7 = vld [vmem:[%s357_s19 + $0x10] sm:$0xff]  ;;  %v1533_v11 = vld [vmem:[%s357_s19 + $0x8] sm:$0xff]  ;;  %s367_s30 = scalar_lea.vmem %s1853_s5, %s1505_s13  ;;  %s377_s11 = scalar_lea.vmem %s1855_s7, %s1505_s13 }
  0x10   : > { %518 = vmatpush.msra.mxu2 %v1517_v5  ;;  %430 = vmatpush.msra.mxu0 %v1515_v4  ;;  %v1542_v12 = vld [vmem:[%s352_s16] sm:$0xff]  ;;  %v1551_v15 = vld [vmem:[%s362_s26 + $0x18] sm:$0xff]  ;;  %v1558_v16 = vld [vmem:[%s362_s26 + $0x10] sm:$0xff] }
  0x11   : > { %1416 = vmatpush.msra.mxu1 %v1519_v6  ;;  %v1544_v13 = vld [vmem:[%s357_s19] sm:$0xff]  ;;  %v1568_v19 = vld [vmem:[%s362_s26 + $0x8] sm:$0xff]  ;;  %v1610_v25 = vld [vmem:[%s1851_s3 + $0x78] sm:$0xff] }
  0x12   : > { %519 = vmatpush.msra.mxu2 %v1523_v7  ;;  %431 = vmatpush.msra.mxu0 %v1519_v6  ;;  %v1572_v20 = vld [vmem:[%s362_s26] sm:$0xff]  ;;  %v1582_v21 = vld [vmem:[%s1851_s3 + $0x48] sm:$0xff]  ;;  %v1622_v27 = vld [vmem:[%s1851_s3 + $0x90] sm:$0xff]  ;;  %s382_s26 = scalar_lea.vmem %s1856_s8, %s1505_s13 }
  0x13   : > { %1417 = vmatpush.msra.mxu1 %v1531_v10  ;;  %v1597_v23 = vld [vmem:[%s1851_s3 + $0x60] sm:$0xff]  ;;  %v1602_v24 = vld [vmem:[%s1851_s3 + $0x68] sm:$0xff]  ;;  %v1627_v28 = vld [vmem:[%s1851_s3 + $0x98] sm:$0xff] }
  0x14   : > { %520 = vmatpush.msra.mxu2 %v1533_v11  ;;  %432 = vmatpush.msra.mxu0 %v1531_v10  ;;  %v1615_v26 = vld [vmem:[%s1851_s3 + $0x80] sm:$0xff]  ;;  %v1634_v29 = vld [vmem:[%s1851_s3 + $0xa8] sm:$0xff]  ;;  %v1639_v30 = vld [vmem:[%s1851_s3 + $0xb0] sm:$0xff] }
  0x15   : > { %443 = vperm.xlu0 %1428, %v397_v8   ;;  %410 = vperm.xlu1 %1429, %v396_v9   ;;  %v1377_v31 = vld [vmem:[%s1852_s4 + $0x18] sm:$0xff]  ;;  %v1376_v32 = vld [vmem:[%s1852_s4 + $0x10] sm:$0xff]  ;;  %v1652_v33 = vld [vmem:[%s1851_s3 + $0x40] sm:$0xff] }
  0x16   : > { %1418 = vmatpush.msra.mxu1 %v1542_v12  ;;  %521 = vmatpush.msra.mxu2 %v1544_v13  ;;  %v1660_v35 = vld [vmem:[%s1851_s3 + $0x58] sm:$0xff]  ;;  %v1396_v37 = vld [vmem:[%s1852_s4 + $0x30] sm:$0xff]  ;;  %v1682_v42 = vld [vmem:[%s1851_s3 + $0x88] sm:$0xff] }
  0x17   : > { %485 = vperm.xlu2 %1430, %v400_v14   ;;  %1353 = vmatmul.msk.f32.vlgmr.msra.gmra.mxu1 %vm413_vm0, %v396_v9  ;;  %v1397_v36 = vld [vmem:[%s1852_s4 + $0x38] sm:$0xff]  ;;  %v1674_v38 = vld [vmem:[%s1851_s3 + $0x70] sm:$0xff]  ;;  %v1691_v49 = vld [vmem:[%s1851_s3 + $0xa0] sm:$0xff] }
  0x18   : > { %1356 = vmatmul.msk.f32.vlgmr.msra.gmra.mxu2 %vm413_vm0, %v399_v3  ;;  %467 = vmatpush.msrb.mxu1 %v1551_v15  ;;  %v1700_v52 = vld [vmem:[%s1851_s3 + $0xb8] sm:$0xff] }
  0x19   : > { %433 = vmatpush.msra.mxu0 %v1542_v12  ;;  %777 = vmatpush.msrb.mxu2 %v1377_v31 }
  0x1a   : > { %468 = vmatpush.msrb.mxu1 %v1558_v16  ;;  %1352 = vmatmul.msk.f32.vlgmr.msra.gmra.mxu0 %vm413_vm0, %v395_v1 }
  0x1b   : > { %778 = vmatpush.msrb.mxu2 %v1376_v32 }
  0x1c   : > { %469 = vmatpush.msrb.mxu1 %v1568_v19 }
  0x1d   : > { %490 = vperm.xlu0 %1428, %v401_v17   ;;  %495 = vperm.xlu1 %1429, %v402_v18  }
  0x1e   : > { %470 = vmatpush.msrb.mxu1 %v1572_v20  ;;  %1051 = vmatpush.msra.mxu2 %v1397_v36 }
  0x1f   : > { %1354 = vmatmul.msk.f32.vlgmr.msrb.gmra.mxu1 %vm413_vm0, %v397_v8  ;;  %673 = vperm.xlu2 %1430, %v1652_v33  }
  0x20   : > { %1357 = vmatmul.msk.f32.gmra.mxu2 %vm413_vm0, %v400_v14 }
  0x21   : > { %1052 = vmatpush.msra.mxu2 %v1396_v37 }
  0x25   : > { %678 = vperm.xlu0 %1428, %v1582_v21   ;;  %683 = vperm.xlu1 %1429, %v1587_v22  }
  0x27   : > { %1355 = vmatmul.msk.f32.gmra.mxu1 %vm413_vm0, %v1496_v0  ;;  %688 = vperm.xlu2 %1430, %v1660_v35  }
  0x28   : > { %1358 = vmatmul.msk.f32.gmra.mxu2 %vm413_vm0, %v401_v17 }
  0x2d   : > { %806 = vperm.xlu0 %1428, %v1597_v23   ;;  %811 = vperm.xlu1 %1429, %v1602_v24  }
  0x2f   : > { %816 = vperm.xlu2 %1430, %v1674_v38  }
  0x30   : > { %1359 = vmatmul.msk.f32.gmra.mxu2 %vm413_vm0, %v402_v18 }
  0x35   : > { %821 = vperm.xlu0 %1428, %v1610_v25   ;;  %943 = vperm.xlu1 %1429, %v1615_v26  }
  0x37   : > { %948 = vperm.xlu2 %1430, %v1682_v42  }
  0x38   : > { %1378 = vmatmul.msk.f32.vlgmr.msrb.gmra.mxu2 %vm535_vm1, %v1542_v12 }
  0x3d   : > { %953 = vperm.xlu0 %1428, %v1622_v27   ;;  %958 = vperm.xlu1 %1429, %v1627_v28  }
  0x3f   : > { %1080 = vperm.xlu2 %1430, %v1691_v49  }
  0x40   : > { %1379 = vmatmul.msk.f32.gmra.mxu2 %vm535_vm1, %v1531_v10 }
  0x45   : > { %1085 = vperm.xlu0 %1428, %v1634_v29   ;;  %1090 = vperm.xlu1 %1429, %v1639_v30  }
  0x47   : > { %1095 = vperm.xlu2 %1430, %v1700_v52  }
  0x48   : > { %1380 = vmatmul.msk.f32.gmra.mxu2 %vm535_vm1, %v1519_v6 }
  0x50   : > { %1381 = vmatmul.msk.f32.gmra.mxu2 %vm535_vm1, %v1515_v4 }
  0x58   : > { %1398 = vmatmul.msk.f32.vlgmr.msra.gmra.mxu2 %vm535_vm1, %v1572_v20 }
  0x60   : > { %1399 = vmatmul.msk.f32.gmra.mxu2 %vm535_vm1, %v1568_v19 }
  0x68   : > { %1400 = vmatmul.msk.f32.gmra.mxu2 %vm535_vm1, %v1558_v16 }
  0x69   : > { %v481_v1 = vpop.permute.xlu2 %480 }
  0x70   : > { %1401 = vmatmul.msk.f32.gmra.mxu2 %vm535_vm1, %v1551_v15 }
  0x71   : > { %v486_v32 = vpop.permute.xlu2 %485 }
  0x7f   : > { %v449_v39 = vpop.permute.xlu0 %448  ;;  %v406_v44 = vpop.permute.xlu1 %405 }
  0x87   : > { %v444_v46 = vpop.permute.xlu0 %443  ;;  %v411_v50 = vpop.permute.xlu1 %410 }
  0x8f   : > { %v491_v37 = vpop.permute.xlu0 %490 }
  0x94   : > { %v438_v34 = vpop.f32.mrf.mxu1 }
  0x95   : > { %v439_v51 = vadd.f32 %v438_v34, %v411_v50 }
  0x97   : > { %v435_v41 = vpop.f32.mrf.mxu0 }
  0x98   : > { %v436_v47 = vadd.f32 %v435_v41, %v406_v44 }
  0x9b   : > { %v523_v53 = vpop.f32.mrf.mxu2 }
  0x9c   : > { %v472_v40 = vpop.f32.mrf.mxu1  ;;  %v524_v3 = vadd.f32 %v523_v53, %v481_v1 }
  0x9d   : > { %v473_v48 = vadd.f32 %v472_v40, %v444_v46 }
  0xa3   : > { %v526_v54 = vpop.f32.mrf.mxu2 }
  0xa4   : > { %v475_v43 = vpop.f32.mrf.mxu1  ;;  %v527_v36 = vadd.f32 %v526_v54, %v486_v32 }
  0xa5   : > { %v476_v45 = vadd.f32 %v475_v43, %v449_v39  ;;  %v496_v43 = vpop.permute.xlu1 %495 }
  0xa7   : > { %556 = vmatpush.msrb.mxu0 %v476_v45 }
  0xa9   : > { %557 = vmatpush.msrb.mxu0 %v473_v48 }
  0xaa   : > { %1360 = vmatmul.msk.f32.vlgmr.msrb.gmra.mxu0 %vm535_vm1, %v436_v47 }
  0xab   : > { %v529_v55 = vpop.f32.mrf.mxu2 }
  0xac   : > { %v530_v40 = vadd.f32 %v529_v55, %v491_v37  ;;  %v617_v55 = vld [vmem:[%s1852_s4 + $0x8] sm:$0xff] }
  0xad   : > { %644 = vmatpush.msra.mxu0 %v617_v55 }
  0xb2   : > { %1361 = vmatmul.msk.f32.gmra.mxu0 %vm535_vm1, %v439_v51 }
  0xb3   : > { %v532_v56 = vpop.f32.mrf.mxu2 }
  0xb4   : > { %v533_v45 = vadd.f32 %v532_v56, %v496_v43 }
  0xbb   : > { %v780_v57 = vpop.f32.mrf.mxu2 }
  0xbc   : > { %v796_v14 = vmul.f32 0.2, %v780_v57  ;;  %vm792_vm5 = vcmp.ge.f32.partialorder %v780_v57, 0.0 }
  0xbe   : > { %v800_v31 = vsel %vm792_vm5, %v780_v57, %v796_v14  ;;  %v1751_v57 = vpop.permute.xlu1 %683 }
  0xc3   : > { %v783_v58 = vpop.f32.mrf.mxu2 }
  0xc4   : > { %v797_v8 = vmul.f32 0.2, %v783_v58  ;;  %vm793_vm4 = vcmp.ge.f32.partialorder %v783_v58, 0.0 }
  0xc6   : > { %v801_v18 = vsel %vm793_vm4, %v783_v58, %v797_v8  ;;  %v812_v1 = vpop.permute.xlu1 %811 }
  0xcb   : > { %v786_v59 = vpop.f32.mrf.mxu2 }
  0xcc   : > { %v798_v0 = vmul.f32 0.2, %v786_v59  ;;  %vm794_vm3 = vcmp.ge.f32.partialorder %v786_v59, 0.0 }
  0xce   : > { %v802_v17 = vsel %vm794_vm3, %v786_v59, %v798_v0 }
  0xd3   : > { %v789_v61 = vpop.f32.mrf.mxu2 }
  0xd4   : > { %v799_v62 = vmul.f32 0.2, %v789_v61  ;;  %vm795_vm2 = vcmp.ge.f32.partialorder %v789_v61, 0.0 }
  0xd6   : > { %v803_v2 = vsel %vm795_vm2, %v789_v61, %v799_v62 }
  0xdb   : > { %v1054_v9 = vpop.f32.mrf.mxu2 }
  0xdc   : > { %v1070_v48 = vmul.f32 0.2, %v1054_v9  ;;  %vm1066_vm9 = vcmp.ge.f32.partialorder %v1054_v9, 0.0 }
  0xde   : > { %v1074_v54 = vsel %vm1066_vm9, %v1054_v9, %v1070_v48 }
  0xe3   : > { %v1057_v34 = vpop.f32.mrf.mxu2 }
  0xe4   : > { %v1071_v46 = vmul.f32 0.2, %v1057_v34  ;;  %vm1067_vm8 = vcmp.ge.f32.partialorder %v1057_v34, 0.0 }
  0xe6   : > { %v1075_v53 = vsel %vm1067_vm8, %v1057_v34, %v1071_v46 }
  0xeb   : > { %v1060_v39 = vpop.f32.mrf.mxu2 }
  0xec   : > { %v1072_v41 = vmul.f32 0.2, %v1060_v39  ;;  %vm1068_vm6 = vcmp.ge.f32.partialorder %v1060_v39, 0.0 }
  0xee   : > { %v1076_v51 = vsel %vm1068_vm6, %v1060_v39, %v1072_v41  ;;  %v1780_v41 = vpop.permute.xlu1 %943 }
  0xf3   : > { %v1063_v44 = vpop.f32.mrf.mxu2 }
  0xf4   : > { %vm1069_vm7 = vcmp.ge.f32.partialorder %v1063_v44, 0.0  ;;  %v1073_v47 = vmul.f32 0.2, %v1063_v44 }
  0xf6   : > { %v1077_v50 = vsel %vm1069_vm7, %v1063_v44, %v1073_v47 }
 0x127   : > { %v559_v60 = vpop.f32.mrf.mxu0 }
 0x12f   : > { %v562_v63 = vpop.f32.mrf.mxu0 }
 0x130   : > { %1362 = vmatpush.xpose.msk.msra.mxu3 %vm535_vm1, %v562_v63 }
 0x134   : > { %1363 = vmatpush.xpose.msk.msra.mxu3 %vm535_vm1, %v559_v60 }
 0x137   : > { %1364 = vmatmul.msk.f32.vlgmr.msra.gmra.mxu3 %vm535_vm1, %v524_v3 }
 0x138   : > { %844 = vmatpush.msrb.mxu3 %v803_v2 }
 0x13a   : > { %845 = vmatpush.msrb.mxu3 %v802_v17 }
 0x13c   : > { %846 = vmatpush.msrb.mxu3 %v801_v18 }
 0x13e   : > { %847 = vmatpush.msrb.mxu3 %v800_v31 }
 0x13f   : > { %1365 = vmatmul.msk.f32.gmra.mxu3 %vm535_vm1, %v527_v36 }
 0x140   : > { %1118 = vmatpush.msra.mxu3 %v1077_v50 }
 0x142   : > { %1119 = vmatpush.msra.mxu3 %v1076_v51  ;;  %v1791_v51 = vpop.permute.xlu1 %958 }
 0x144   : > { %1120 = vmatpush.msra.mxu3 %v1075_v53 }
 0x146   : > { %1121 = vmatpush.msra.mxu3 %v1074_v54 }
 0x147   : > { %1366 = vmatmul.msk.f32.gmra.mxu3 %vm535_vm1, %v530_v40 }
 0x14f   : > { %1367 = vmatmul.msk.f32.gmra.mxu3 %vm535_vm1, %v533_v45 }
 0x157   : > { %1382 = vmatmul.msk.f32.vlgmr.msrb.gmra.mxu3 %vm413_vm0, %v1597_v23  ;;  %v616_v23 = vld [vmem:[%s1852_s4] sm:$0xff] }
 0x158   : > { %645 = vmatpush.msra.mxu0 %v616_v23 }
 0x15f   : > { %1383 = vmatmul.msk.f32.gmra.mxu3 %vm413_vm0, %v1602_v24  ;;  %v1387_v24 = vld [vmem:[%s1852_s4 + $0x28] sm:$0xff] }
 0x160   : > { %914 = vmatpush.msrb.mxu0 %v1387_v24 }
 0x167   : > { %1384 = vmatmul.msk.f32.gmra.mxu3 %vm413_vm0, %v1674_v38 }
 0x16f   : > { %1385 = vmatmul.msk.f32.gmra.mxu3 %vm413_vm0, %v1610_v25  ;;  %v1386_v25 = vld [vmem:[%s1852_s4 + $0x20] sm:$0xff] }
 0x170   : > { %915 = vmatpush.msrb.mxu0 %v1386_v25 }
 0x177   : > { %1402 = vmatmul.msk.f32.vlgmr.msra.gmra.mxu3 %vm413_vm0, %v1691_v49  ;;  %v1746_v49 = vpop.permute.xlu0 %678 }
 0x17f   : > { %1403 = vmatmul.msk.f32.gmra.mxu3 %vm413_vm0, %v1634_v29  ;;  %v807_v58 = vpop.permute.xlu0 %806 }
 0x187   : > { %1404 = vmatmul.msk.f32.gmra.mxu3 %vm413_vm0, %v1639_v30  ;;  %v822_v32 = vpop.permute.xlu0 %821 }
 0x18f   : > { %1405 = vmatmul.msk.f32.gmra.mxu3 %vm413_vm0, %v1700_v52  ;;  %v1748_v52 = vpop.permute.xlu2 %673  ;;  %v1782_v44 = vpop.permute.xlu0 %953 }
 0x197   : > { %v1755_v61 = vpop.permute.xlu2 %688  ;;  %v1086_v54 = vpop.permute.xlu0 %1085 }
 0x19f   : > { %v817_v9 = vpop.permute.xlu2 %816 }
 0x1a7   : > { %v1773_v36 = vpop.permute.xlu2 %948 }
 0x1af   : > { %v1081_v46 = vpop.permute.xlu2 %1080 }
 0x1ba   : > { %v600_v29 = vpop.f32.mrf.mxu3 }
 0x1bb   : > { %1368 = vmatmul.msk.f32.vlgmr.msra.gmra.mxu0 %vm535_vm1, %v600_v29  ;;  %v1091_v29 = vpop.permute.xlu1 %1090 }
 0x1c2   : > { %v603_v30 = vpop.f32.mrf.mxu3 }
 0x1c3   : > { %1369 = vmatmul.msk.f32.gmra.mxu0 %vm535_vm1, %v603_v30 }
 0x1ca   : > { %v606_v38 = vpop.f32.mrf.mxu3 }
 0x1cb   : > { %1370 = vmatmul.msk.f32.gmra.mxu0 %vm535_vm1, %v606_v38 }
 0x1d2   : > { %v609_v56 = vpop.f32.mrf.mxu3 }
 0x1d3   : > { %1371 = vmatmul.msk.f32.gmra.mxu0 %vm535_vm1, %v609_v56 }
 0x1da   : > { %v849_v59 = vpop.f32.mrf.mxu3 }
 0x1db   : > { %v850_v60 = vadd.f32 %v849_v59, %v807_v58  ;;  %1388 = vmatmul.msk.f32.vlgmr.msrb.gmra.mxu0 %vm535_vm1, %v1544_v13  ;;  %v1096_v59 = vpop.permute.xlu2 %1095 }
 0x1dd   : > { %vm861_vm10 = vcmp.ge.f32.partialorder %v850_v60, 0.0  ;;  %v865_v62 = vmul.f32 0.2, %v850_v60 }
 0x1df   : > { %v869_v63 = vsel %vm861_vm10, %v850_v60, %v865_v62 }
 0x1e0   : > { %v873_v0 = vadd.f32 %v869_v63, %v1542_v12 }
 0x1e2   : > { %877 = vst.msk [vmem:[%s1761_s23] sm:$0xff] %vm535_vm1, %v873_v0  ;;  %v852_v2 = vpop.f32.mrf.mxu3 }
 0x1e3   : > { %v853_v3 = vadd.f32 %v852_v2, %v812_v1  ;;  %1389 = vmatmul.msk.f32.gmra.mxu0 %vm535_vm1, %v1533_v11 }
 0x1e5   : > { %vm862_vm11 = vcmp.ge.f32.partialorder %v853_v3, 0.0  ;;  %v866_v8 = vmul.f32 0.2, %v853_v3 }
 0x1e7   : > { %v870_v14 = vsel %vm862_vm11, %v853_v3, %v866_v8 }
 0x1e8   : > { %v874_v17 = vadd.f32 %v870_v14, %v1531_v10 }
 0x1ea   : > { %878 = vst.msk [vmem:[%s1761_s23 + $0x8] sm:$0xff] %vm535_vm1, %v874_v17  ;;  %v855_v18 = vpop.f32.mrf.mxu3 }
 0x1eb   : > { %v856_v31 = vadd.f32 %v855_v18, %v817_v9  ;;  %1390 = vmatmul.msk.f32.gmra.mxu0 %vm535_vm1, %v1523_v7 }
 0x1ed   : > { %vm863_vm12 = vcmp.ge.f32.partialorder %v856_v31, 0.0  ;;  %v867_v12 = vmul.f32 0.2, %v856_v31 }
 0x1ef   : > { %v871_v34 = vsel %vm863_vm12, %v856_v31, %v867_v12 }
 0x1f0   : > { %v875_v37 = vadd.f32 %v871_v34, %v1519_v6 }
 0x1f2   : > { %879 = vst.msk [vmem:[%s1761_s23 + $0x10] sm:$0xff] %vm535_vm1, %v875_v37  ;;  %v858_v10 = vpop.f32.mrf.mxu3 }
 0x1f3   : > { %v859_v39 = vadd.f32 %v858_v10, %v822_v32  ;;  %1391 = vmatmul.msk.f32.gmra.mxu0 %vm535_vm1, %v1517_v5 }
 0x1f5   : > { %vm864_vm13 = vcmp.ge.f32.partialorder %v859_v39, 0.0  ;;  %v868_v40 = vmul.f32 0.2, %v859_v39 }
 0x1f7   : > { %v872_v43 = vsel %vm864_vm13, %v859_v39, %v868_v40 }
 0x1f8   : > { %v876_v45 = vadd.f32 %v872_v43, %v1515_v4 }
 0x1fa   : > { %880 = vst.msk [vmem:[%s1761_s23 + $0x18] sm:$0xff] %vm535_vm1, %v876_v45  ;;  %v1123_v6 = vpop.f32.mrf.mxu3 }
 0x1fb   : > { %v1124_v47 = vadd.f32 %v1123_v6, %v1081_v46 }
 0x1fd   : > { %vm1135_vm14 = vcmp.ge.f32.partialorder %v1124_v47, 0.0  ;;  %v1139_v48 = vmul.f32 0.2, %v1124_v47 }
 0x1ff   : > { %v1143_v50 = vsel %vm1135_vm14, %v1124_v47, %v1139_v48 }
 0x200   : > { %v1147_v53 = vadd.f32 %v1143_v50, %v1572_v20 }
 0x202   : > { %1151 = vst.msk [vmem:[%s382_s26] sm:$0xff] %vm535_vm1, %v1147_v53  ;;  %v1126_v4 = vpop.f32.mrf.mxu3 }
 0x203   : > { %v1127_v55 = vadd.f32 %v1126_v4, %v1086_v54 }
 0x205   : > { %vm1136_vm15 = vcmp.ge.f32.partialorder %v1127_v55, 0.0  ;;  %v1140_v23 = vmul.f32 0.2, %v1127_v55 }
 0x207   : > { %v1144_v24 = vsel %vm1136_vm15, %v1127_v55, %v1140_v23 }
 0x208   : > { %v1148_v25 = vadd.f32 %v1144_v24, %v1568_v19 }
 0x20a   : > { %1152 = vst.msk [vmem:[%s382_s26 + $0x8] sm:$0xff] %vm535_vm1, %v1148_v25  ;;  %v1129_v30 = vpop.f32.mrf.mxu3 }
 0x20b   : > { %v1130_v38 = vadd.f32 %v1129_v30, %v1091_v29 }
 0x20d   : > { %vm1137_vm2 = vcmp.ge.f32.partialorder %v1130_v38, 0.0  ;;  %v1141_v56 = vmul.f32 0.2, %v1130_v38 }
 0x20f   : > { %v1145_v58 = vsel %vm1137_vm2, %v1130_v38, %v1141_v56 }
 0x210   : > { %v1149_v20 = vadd.f32 %v1145_v58, %v1558_v16 }
 0x212   : > { %1153 = vst.msk [vmem:[%s382_s26 + $0x10] sm:$0xff] %vm535_vm1, %v1149_v20  ;;  %v1132_v60 = vpop.f32.mrf.mxu3 }
 0x213   : > { %v1133_v62 = vadd.f32 %v1132_v60, %v1096_v59 }
 0x215   : > { %vm1138_vm3 = vcmp.ge.f32.partialorder %v1133_v62, 0.0  ;;  %v1142_v63 = vmul.f32 0.2, %v1133_v62 }
 0x217   : > { %v1146_v0 = vsel %vm1138_vm3, %v1133_v62, %v1142_v63 }
 0x218   : > { %v1150_v19 = vadd.f32 %v1146_v0, %v1551_v15 }
 0x21a   : > { %1154 = vst.msk [vmem:[%s382_s26 + $0x18] sm:$0xff] %vm535_vm1, %v1150_v19 }
 0x238   : > { %v647_v1 = vpop.f32.mrf.mxu0 }
 0x239   : > { %v663_v18 = vmul.f32 0.2, %v647_v1  ;;  %vm659_vm7 = vcmp.ge.f32.partialorder %v647_v1, 0.0 }
 0x23b   : > { %v667_v32 = vsel %vm659_vm7, %v647_v1, %v663_v18 }
 0x240   : > { %v650_v2 = vpop.f32.mrf.mxu0 }
 0x241   : > { %v664_v16 = vmul.f32 0.2, %v650_v2  ;;  %vm660_vm6 = vcmp.ge.f32.partialorder %v650_v2, 0.0 }
 0x243   : > { %v668_v12 = vsel %vm660_vm6, %v650_v2, %v664_v16 }
 0x248   : > { %v653_v3 = vpop.f32.mrf.mxu0 }
 0x249   : > { %v665_v9 = vmul.f32 0.2, %v653_v3  ;;  %vm661_vm5 = vcmp.ge.f32.partialorder %v653_v3, 0.0 }
 0x24b   : > { %v669_v31 = vsel %vm661_vm5, %v653_v3, %v665_v9 }
 0x250   : > { %v656_v8 = vpop.f32.mrf.mxu0 }
 0x251   : > { %vm662_vm4 = vcmp.ge.f32.partialorder %v656_v8, 0.0  ;;  %v666_v14 = vmul.f32 0.2, %v656_v8 }
 0x253   : > { %v670_v17 = vsel %vm662_vm4, %v656_v8, %v666_v14 }
 0x254   : > { %711 = vmatpush.msra.mxu1 %v670_v17 }
 0x256   : > { %712 = vmatpush.msra.mxu1 %v669_v31 }
 0x258   : > { %713 = vmatpush.msra.mxu1 %v668_v12  ;;  %v917_v15 = vpop.f32.mrf.mxu0 }
 0x259   : > { %vm929_vm11 = vcmp.ge.f32.partialorder %v917_v15, 0.0 }
 0x25a   : > { %714 = vmatpush.msra.mxu1 %v667_v32 }
 0x25b   : > { %1372 = vmatmul.msk.f32.vlgmr.msra.gmra.mxu1 %vm413_vm0, %v1652_v33  ;;  %v933_v33 = vmul.f32 0.2, %v917_v15 }
 0x260   : > { %v920_v34 = vpop.f32.mrf.mxu0 }
 0x261   : > { %v934_v43 = vmul.f32 0.2, %v920_v34  ;;  %vm930_vm10 = vcmp.ge.f32.partialorder %v920_v34, 0.0 }
 0x263   : > { %1373 = vmatmul.msk.f32.gmra.mxu1 %vm413_vm0, %v1582_v21  ;;  %v938_v21 = vsel %vm930_vm10, %v920_v34, %v934_v43 }
 0x268   : > { %v923_v37 = vpop.f32.mrf.mxu0 }
 0x269   : > { %v935_v39 = vmul.f32 0.2, %v923_v37  ;;  %vm931_vm9 = vcmp.ge.f32.partialorder %v923_v37, 0.0 }
 0x26b   : > { %1374 = vmatmul.msk.f32.gmra.mxu1 %vm413_vm0, %v1587_v22  ;;  %v939_v46 = vsel %vm931_vm9, %v923_v37, %v935_v39  ;;  %v937_v22 = vsel %vm929_vm11, %v917_v15, %v933_v33 }
 0x270   : > { %v926_v10 = vpop.f32.mrf.mxu0 }
 0x271   : > { %vm932_vm8 = vcmp.ge.f32.partialorder %v926_v10, 0.0  ;;  %v936_v40 = vmul.f32 0.2, %v926_v10 }
 0x273   : > { %v940_v45 = vsel %vm932_vm8, %v926_v10, %v936_v40  ;;  %1375 = vmatmul.msk.f32.gmra.mxu1 %vm413_vm0, %v1660_v35 }
 0x274   : > { %981 = vmatpush.msrb.mxu1 %v940_v45 }
 0x276   : > { %982 = vmatpush.msrb.mxu1 %v939_v46 }
 0x278   : > { %983 = vmatpush.msrb.mxu1 %v938_v21 }
 0x27a   : > { %984 = vmatpush.msrb.mxu1 %v937_v22 }
 0x27b   : > { %1392 = vmatmul.msk.f32.vlgmr.msrb.gmra.mxu1 %vm413_vm0, %v1615_v26 }
 0x283   : > { %1393 = vmatmul.msk.f32.gmra.mxu1 %vm413_vm0, %v1682_v42 }
 0x28b   : > { %1394 = vmatmul.msk.f32.gmra.mxu1 %vm413_vm0, %v1622_v27 }
 0x293   : > { %1395 = vmatmul.msk.f32.gmra.mxu1 %vm413_vm0, %v1627_v28 }
 0x2d8   : > { %v716_v35 = vpop.f32.mrf.mxu1 }
 0x2d9   : > { %v717_v6 = vadd.f32 %v716_v35, %v1748_v52 }
 0x2db   : > { %vm728_vm12 = vcmp.ge.f32.partialorder %v717_v6, 0.0  ;;  %v732_v47 = vmul.f32 0.2, %v717_v6 }
 0x2dd   : > { %v736_v48 = vsel %vm728_vm12, %v717_v6, %v732_v47 }
 0x2de   : > { %740 = vst.msk [vmem:[%s367_s30] sm:$0xff] %vm535_vm1, %v736_v48 }
 0x2e0   : > { %v719_v26 = vpop.f32.mrf.mxu1 }
 0x2e1   : > { %v720_v42 = vadd.f32 %v719_v26, %v1746_v49 }
 0x2e3   : > { %vm729_vm13 = vcmp.ge.f32.partialorder %v720_v42, 0.0  ;;  %v733_v27 = vmul.f32 0.2, %v720_v42 }
 0x2e5   : > { %v737_v50 = vsel %vm729_vm13, %v720_v42, %v733_v27 }
 0x2e6   : > { %741 = vst.msk [vmem:[%s367_s30 + $0x8] sm:$0xff] %vm535_vm1, %v737_v50 }
 0x2e8   : > { %v722_v28 = vpop.f32.mrf.mxu1 }
 0x2e9   : > { %v723_v52 = vadd.f32 %v722_v28, %v1751_v57 }
 0x2eb   : > { %vm730_vm0 = vcmp.ge.f32.partialorder %v723_v52, 0.0  ;;  %v734_v53 = vmul.f32 0.2, %v723_v52 }
 0x2ed   : > { %v738_v54 = vsel %vm730_vm0, %v723_v52, %v734_v53 }
 0x2ee   : > { %742 = vst.msk [vmem:[%s367_s30 + $0x10] sm:$0xff] %vm535_vm1, %v738_v54 }
 0x2f0   : > { %v725_v4 = vpop.f32.mrf.mxu1 }
 0x2f1   : > { %v726_v55 = vadd.f32 %v725_v4, %v1755_v61 }
 0x2f3   : > { %vm731_vm14 = vcmp.ge.f32.partialorder %v726_v55, 0.0  ;;  %v735_v23 = vmul.f32 0.2, %v726_v55 }
 0x2f5   : > { %v739_v49 = vsel %vm731_vm14, %v726_v55, %v735_v23 }
 0x2f6   : > { %743 = vst.msk [vmem:[%s367_s30 + $0x18] sm:$0xff] %vm535_vm1, %v739_v49 }
 0x2f8   : > { %v986_v24 = vpop.f32.mrf.mxu1 }
 0x2f9   : > { %v987_v25 = vadd.f32 %v986_v24, %v1780_v41 }
 0x2fb   : > { %vm998_vm15 = vcmp.ge.f32.partialorder %v987_v25, 0.0  ;;  %v1002_v29 = vmul.f32 0.2, %v987_v25 }
 0x2fd   : > { %v1006_v57 = vsel %vm998_vm15, %v987_v25, %v1002_v29 }
 0x2fe   : > { %v1010_v30 = vadd.f32 %v1006_v57, %v1544_v13 }
 0x300   : > { %1014 = vst.msk [vmem:[%s377_s11] sm:$0xff] %vm535_vm1, %v1010_v30  ;;  %v989_v61 = vpop.f32.mrf.mxu1 }
 0x301   : > { %v990_v38 = vadd.f32 %v989_v61, %v1773_v36 }
 0x303   : > { %vm999_vm2 = vcmp.ge.f32.partialorder %v990_v38, 0.0  ;;  %v1003_v56 = vmul.f32 0.2, %v990_v38 }
 0x305   : > { %v1007_v58 = vsel %vm999_vm2, %v990_v38, %v1003_v56 }
 0x306   : > { %v1011_v20 = vadd.f32 %v1007_v58, %v1533_v11 }
 0x308   : > { %1015 = vst.msk [vmem:[%s377_s11 + $0x8] sm:$0xff] %vm535_vm1, %v1011_v20  ;;  %v992_v41 = vpop.f32.mrf.mxu1 }
 0x309   : > { %v993_v59 = vadd.f32 %v992_v41, %v1782_v44 }
 0x30b   : > { %vm1000_vm3 = vcmp.ge.f32.partialorder %v993_v59, 0.0  ;;  %v1004_v60 = vmul.f32 0.2, %v993_v59 }
 0x30d   : > { %v1008_v62 = vsel %vm1000_vm3, %v993_v59, %v1004_v60 }
 0x30e   : > { %v1012_v13 = vadd.f32 %v1008_v62, %v1523_v7 }
 0x310   : > { %1016 = vst.msk [vmem:[%s377_s11 + $0x10] sm:$0xff] %vm535_vm1, %v1012_v13  ;;  %v995_v63 = vpop.f32.mrf.mxu1 }
 0x311   : > { %v996_v36 = vadd.f32 %v995_v63, %v1791_v51 }
 0x313   : > { %vm1001_vm4 = vcmp.ge.f32.partialorder %v996_v36, 0.0  ;;  %v1005_v0 = vmul.f32 0.2, %v996_v36 }
 0x315   : > { %v1009_v19 = vsel %vm1001_vm4, %v996_v36, %v1005_v0 }
 0x316   : > { %v1013_v11 = vadd.f32 %v1009_v19, %v1517_v5 }
 0x318   : > { %1017 = vst.msk [vmem:[%s377_s11 + $0x18] sm:$0xff] %vm535_vm1, %v1013_v11 }
 0x319 PF: > { %s19_s27 = sadd.s32 1, %s1437_s27  }
 0x31a   : > { %p16_p4 = scmp.ge.s32.totalorder %s19_s27, 4  }
 0x31c   :  { %18 = sbr.rel (!%p16_p4) target bundleno = 1 (0x1), region = 115 }

</bundles_post_ra>
